<compile_context>
chip_gen: v7x
topology: tpu7x:2x2x1
jax: 0.10.0
libtpu: 0.0.40
codegen_flags: <defaults>
</compile_context>

<pallas_src>
import functools

import jax
import jax.numpy as jnp
from jax.experimental import pallas as pl
from jax.experimental.pallas import tpu as pltpu


def _round_up(x, m):
    return ((x + m - 1) // m) * m


def _densegrid_fused_kernel(pts_ref, *refs, lods, f_pad):
    """All LODs for one tile of points.

    pts_ref : (3, TN)                 xyz on sublanes, points on lanes
    per LOD l (res = lods[l], rr = res*res), refs[3l:3l+3]:
        grid : (res, f_pad, rr)       x-major slabs, (y,z) flattened on lanes
        gy   : (rr, 1)                y lattice coordinate of each (y,z) cell
        gz   : (rr, 1)                z lattice coordinate of each (y,z) cell
    out_ref : (num_lods * f_pad, TN)  channel-major, lane-dense
    """
    num_lods = len(lods)
    out_ref = refs[3 * num_lods]
    tn = pts_ref.shape[1]

    px = pts_ref[0:1, :]                   # (1, TN)
    py = pts_ref[1:2, :]
    pz = pts_ref[2:3, :]

    for l, res in enumerate(lods):
        grid_ref = refs[3 * l]             # (res, f_pad, rr)
        gy = refs[3 * l + 1][...]          # (rr, 1)
        gz = refs[3 * l + 2][...]          # (rr, 1)

        # [-1, 1] -> [0, res-1], clamped (matches the gather reference).
        scale = (res - 1) * 0.5
        hi = float(res - 1)
        qx = jnp.clip((px + 1.0) * scale, 0.0, hi)     # (1, TN)
        qy = jnp.clip((py + 1.0) * scale, 0.0, hi)
        qz = jnp.clip((pz + 1.0) * scale, 0.0, hi)

        # Separable trilinear weights: dense tent product only over the (y,z)
        # plane; the x axis is folded into the slab matmul loop below.
        wy = jnp.maximum(1.0 - jnp.abs(qy - gy), 0.0)  # (rr, TN)
        wz = jnp.maximum(1.0 - jnp.abs(qz - gz), 0.0)  # (rr, TN)
        wyz = wy * wz                                  # (rr, TN)

        acc = jnp.zeros((f_pad, tn), dtype=jnp.float32)
        for x in range(res):               # static unroll; res is small here
            wx = jnp.maximum(1.0 - jnp.abs(qx - float(x)), 0.0)   # (1, TN)
            slab = jnp.dot(grid_ref[x], wyz,
                           preferred_element_type=jnp.float32)    # (f_pad, TN)
            acc = acc + wx * slab

        out_ref[l * f_pad:(l + 1) * f_pad, :] = acc


def _pack_lod(grid, res, feat_dim, f_pad):
    """(res^3, F) -> x-major slabs (res, f_pad, res^2) + (y,z) lattice coords."""
    rr = res * res
    g = jnp.transpose(grid.reshape(res, res, res, feat_dim),
                      (0, 3, 1, 2)).reshape(res, feat_dim, rr)
    g = jnp.pad(g, ((0, 0), (0, f_pad - feat_dim), (0, 0)))
    yz = jnp.arange(rr)
    gy = (yz // res).astype(jnp.float32).reshape(rr, 1)
    gz = (yz % res).astype(jnp.float32).reshape(rr, 1)
    return g, gy, gz


def _dense_grid_forward_packed(pts, packed, *, lods, feat_dim,
                               max_tile_n=1024,
                               vmem_limit_bytes=48 * 1024 * 1024):
    """Fused multi-LOD trilinear interp.  Returns (N, num_lods * feat_dim)."""
    N = pts.shape[0]
    num_lods = len(lods)
    f_pad = _round_up(feat_dim, 8)          # pad feature rows to a sublane tile
    c_pad = num_lods * f_pad

    tile_n = min(max_tile_n, _round_up(max(N, 1), 128))
    n_pad = _round_up(N, tile_n)

    pts_t = jnp.transpose(pts.astype(jnp.float32))     # (3, N), lane-dense
    if n_pad != N:
        pts_t = jnp.pad(pts_t, ((0, 0), (0, n_pad - N)))

    inputs = [pts_t]
    in_specs = [pl.BlockSpec((3, tile_n), lambda i: (0, i))]
    for l, res in enumerate(lods):
        rr = res * res
        g_arr, gy, gz = packed[3 * l], packed[3 * l + 1], packed[3 * l + 2]
        inputs += [g_arr, gy, gz]
        in_specs += [
            pl.BlockSpec((res, f_pad, rr), lambda i: (0, 0, 0)),  # resident
            pl.BlockSpec((rr, 1), lambda i: (0, 0)),              # resident
            pl.BlockSpec((rr, 1), lambda i: (0, 0)),              # resident
        ]

    out_raw = pl.pallas_call(
        functools.partial(_densegrid_fused_kernel, lods=tuple(lods),
                          f_pad=f_pad),
        out_shape=jax.ShapeDtypeStruct((c_pad, n_pad), jnp.float32),
        grid=(n_pad // tile_n,),
        in_specs=in_specs,
        out_specs=pl.BlockSpec((c_pad, tile_n), lambda i: (0, i)),
        compiler_params=pltpu.CompilerParams(
            dimension_semantics=("parallel",),
            vmem_limit_bytes=vmem_limit_bytes),
    )(*inputs)

    # (num_lods*f_pad, n_pad) -> (N, num_lods*feat_dim) == torch.cat(dim=1).
    out = out_raw.reshape(num_lods, f_pad, n_pad)[:, :feat_dim, :N]
    return jnp.transpose(out, (2, 0, 1)).reshape(N, num_lods * feat_dim)


def dense_grid_forward(pts, grids, lods, feat_dim, **kw):
    """Convenience wrapper taking raw (res^3, feat_dim) grids."""
    f_pad = _round_up(feat_dim, 8)
    packed = []
    for res, g in zip(lods, grids):
        packed.extend(_pack_lod(g, res, feat_dim, f_pad))
    return _dense_grid_forward_packed(pts, tuple(packed), lods=tuple(lods),
                                      feat_dim=feat_dim, **kw)


class DenseGridPallas:
    """JAX/Pallas port of the PyTorch DenseGrid module (forward pass)."""

    def __init__(self, base_lod, num_lods, feat_dim, key):
        self.LOD = [2 ** l for l in range(base_lod, base_lod + num_lods)]
        self.feat_dim = feat_dim
        f_pad = _round_up(feat_dim, 8)
        self.feature_grids = []
        packed = []
        for lod in self.LOD:
            key, sub = jax.random.split(key)
            # torch.nn.init.normal_(grid, mean=0, std=0.01)
            g = 0.01 * jax.random.normal(sub, (lod ** 3, feat_dim),
                                         dtype=jnp.float32)
            self.feature_grids.append(g)
            packed.extend(_pack_lod(g, lod, feat_dim, f_pad))
        # Grid repacking + lattice coords are parameters: do it once here, not
        # per forward call.  The forward itself is jitted so the host-side
        # transpose / pad / slice fuse around the pallas_call.
        self._packed = tuple(packed)
        self._fwd = jax.jit(functools.partial(
            _dense_grid_forward_packed, lods=tuple(self.LOD),
            feat_dim=feat_dim))

    def __call__(self, pts):
        return self._fwd(pts, self._packed)


# ----------------------- pure-JAX reference (gather-based) -----------------
def _trilinear_ref(grid, pts, res):
    p = (pts + 1.0) * 0.5 * (res - 1)                 # (N, 3)
    p = jnp.clip(p, 0.0, res - 1)
    x0 = jnp.floor(p).astype(jnp.int32)
    x0 = jnp.clip(x0, 0, res - 2) if res > 1 else x0
    frac = p - x0.astype(jnp.float32)                 # (N, 3)
    out = 0.0
    for dx in (0, 1):
        for dy in (0, 1):
            for dz in (0, 1):
                cx = x0[:, 0] + dx
                cy = x0[:, 1] + dy
                cz = x0[:, 2] + dz
                idx = cx * res * res + cy * res + cz
                wx = frac[:, 0] if dx else 1.0 - frac[:, 0]
                wy = frac[:, 1] if dy else 1.0 - frac[:, 1]
                wz = frac[:, 2] if dz else 1.0 - frac[:, 2]
                w = (wx * wy * wz)[:, None]
                out = out + w * jnp.take(grid, idx, axis=0)
    return out


def dense_grid_ref(model, pts):
    feats = [_trilinear_ref(g, pts, lod)
             for g, lod in zip(model.feature_grids, model.LOD)]
    return jnp.concatenate(feats, axis=1)


if __name__ == "__main__":
    key = jax.random.PRNGKey(0)
    k_grid, k_pts = jax.random.split(key)

    base_lod, num_lods, feat_dim = 2, 2, 4     # LODs = [4, 8]
    N = 200                                    # not tile-aligned: exercises padding

    model = DenseGridPallas(base_lod, num_lods, feat_dim, k_grid)
    pts = jax.random.uniform(k_pts, (N, 3), dtype=jnp.float32,
                             minval=-1.0, maxval=1.0)

    out = model(pts)
    jax.block_until_ready(out)

    ref = dense_grid_ref(model, pts)
    assert out.shape == (N, num_lods * feat_dim), out.shape
    max_err = float(jnp.max(jnp.abs(out - ref)))
    assert jnp.allclose(out, ref, atol=1e-5, rtol=1e-5), max_err

    print("KERNEL_OK")
</pallas_src>

<mosaic_0001>
module attributes {stable_mosaic.version = 11 : i64} {
  func.func @_densegrid_fused_kernel(%arg0: i32, %arg1: memref<3x256xf32, #tpu.memory_space<vmem>>, %arg2: memref<4x8x16xf32, #tpu.memory_space<vmem>>, %arg3: memref<16x1xf32, #tpu.memory_space<vmem>>, %arg4: memref<16x1xf32, #tpu.memory_space<vmem>>, %arg5: memref<8x8x64xf32, #tpu.memory_space<vmem>>, %arg6: memref<64x1xf32, #tpu.memory_space<vmem>>, %arg7: memref<64x1xf32, #tpu.memory_space<vmem>>, %arg8: memref<16x256xf32, #tpu.memory_space<vmem>>) attributes {dimension_semantics = [#tpu.dimension_semantics<parallel>], iteration_bounds = array<i64: 1>, scalar_prefetch = 0 : i64, scratch_operands = 0 : i64, tpu.core_type = #tpu.core_type<tc>, window_params = [{transform_indices = @transform_0, window_bounds = array<i64: 3, 256>}, {pipeline_mode = #tpu.pipeline_mode<synchronous>, transform_indices = @transform_1, window_bounds = array<i64: 4, 8, 16>}, {pipeline_mode = #tpu.pipeline_mode<synchronous>, transform_indices = @transform_2, window_bounds = array<i64: 16, 1>}, {pipeline_mode = #tpu.pipeline_mode<synchronous>, transform_indices = @transform_3, window_bounds = array<i64: 16, 1>}, {pipeline_mode = #tpu.pipeline_mode<synchronous>, transform_indices = @transform_4, window_bounds = array<i64: 8, 8, 64>}, {pipeline_mode = #tpu.pipeline_mode<synchronous>, transform_indices = @transform_5, window_bounds = array<i64: 64, 1>}, {pipeline_mode = #tpu.pipeline_mode<synchronous>, transform_indices = @transform_6, window_bounds = array<i64: 64, 1>}, {transform_indices = @transform_7, window_bounds = array<i64: 16, 256>}]} {
    %c0 = arith.constant 0 : index
    %c0_0 = arith.constant 0 : index
    %0 = vector.load %arg1[%c0, %c0_0] : memref<3x256xf32, #tpu.memory_space<vmem>>, vector<1x256xf32>
    %c1 = arith.constant 1 : index
    %c0_1 = arith.constant 0 : index
    %1 = vector.load %arg1[%c1, %c0_1] : memref<3x256xf32, #tpu.memory_space<vmem>>, vector<1x256xf32>
    %c2 = arith.constant 2 : index
    %c0_2 = arith.constant 0 : index
    %2 = vector.load %arg1[%c2, %c0_2] : memref<3x256xf32, #tpu.memory_space<vmem>>, vector<1x256xf32>
    %c0_3 = arith.constant 0 : index
    %c0_4 = arith.constant 0 : index
    %3 = vector.load %arg3[%c0_3, %c0_4] : memref<16x1xf32, #tpu.memory_space<vmem>>, vector<16x1xf32>
    %c0_5 = arith.constant 0 : index
    %c0_6 = arith.constant 0 : index
    %4 = vector.load %arg4[%c0_5, %c0_6] : memref<16x1xf32, #tpu.memory_space<vmem>>, vector<16x1xf32>
    %cst = arith.constant 1.000000e+00 : f32
    %5 = vector.broadcast %cst : f32 to vector<1x256xf32>
    %6 = arith.addf %0, %5 : vector<1x256xf32>
    %cst_7 = arith.constant 1.500000e+00 : f32
    %7 = vector.broadcast %cst_7 : f32 to vector<1x256xf32>
    %8 = arith.mulf %6, %7 : vector<1x256xf32>
    %cst_8 = arith.constant 0.000000e+00 : f32
    %cst_9 = arith.constant 3.000000e+00 : f32
    %9 = vector.broadcast %cst_8 : f32 to vector<1x256xf32>
    %10 = arith.maximumf %9, %8 : vector<1x256xf32>
    %11 = vector.broadcast %cst_9 : f32 to vector<1x256xf32>
    %12 = arith.minimumf %11, %10 : vector<1x256xf32>
    %cst_10 = arith.constant 1.000000e+00 : f32
    %13 = vector.broadcast %cst_10 : f32 to vector<1x256xf32>
    %14 = arith.addf %1, %13 : vector<1x256xf32>
    %cst_11 = arith.constant 1.500000e+00 : f32
    %15 = vector.broadcast %cst_11 : f32 to vector<1x256xf32>
    %16 = arith.mulf %14, %15 : vector<1x256xf32>
    %cst_12 = arith.constant 0.000000e+00 : f32
    %cst_13 = arith.constant 3.000000e+00 : f32
    %17 = vector.broadcast %cst_12 : f32 to vector<1x256xf32>
    %18 = arith.maximumf %17, %16 : vector<1x256xf32>
    %19 = vector.broadcast %cst_13 : f32 to vector<1x256xf32>
    %20 = arith.minimumf %19, %18 : vector<1x256xf32>
    %cst_14 = arith.constant 1.000000e+00 : f32
    %21 = vector.broadcast %cst_14 : f32 to vector<1x256xf32>
    %22 = arith.addf %2, %21 : vector<1x256xf32>
    %cst_15 = arith.constant 1.500000e+00 : f32
    %23 = vector.broadcast %cst_15 : f32 to vector<1x256xf32>
    %24 = arith.mulf %22, %23 : vector<1x256xf32>
    %cst_16 = arith.constant 0.000000e+00 : f32
    %cst_17 = arith.constant 3.000000e+00 : f32
    %25 = vector.broadcast %cst_16 : f32 to vector<1x256xf32>
    %26 = arith.maximumf %25, %24 : vector<1x256xf32>
    %27 = vector.broadcast %cst_17 : f32 to vector<1x256xf32>
    %28 = arith.minimumf %27, %26 : vector<1x256xf32>
    %29 = vector.broadcast %20 : vector<1x256xf32> to vector<16x256xf32>
    %30 = vector.broadcast %3 : vector<16x1xf32> to vector<16x256xf32>
    %31 = arith.subf %29, %30 : vector<16x256xf32>
    %32 = math.absf %31 : vector<16x256xf32>
    %cst_18 = arith.constant 1.000000e+00 : f32
    %33 = vector.broadcast %cst_18 : f32 to vector<16x256xf32>
    %34 = arith.subf %33, %32 : vector<16x256xf32>
    %cst_19 = arith.constant 0.000000e+00 : f32
    %35 = vector.broadcast %cst_19 : f32 to vector<16x256xf32>
    %36 = arith.maximumf %34, %35 : vector<16x256xf32>
    %37 = vector.broadcast %28 : vector<1x256xf32> to vector<16x256xf32>
    %38 = vector.broadcast %4 : vector<16x1xf32> to vector<16x256xf32>
    %39 = arith.subf %37, %38 : vector<16x256xf32>
    %40 = math.absf %39 : vector<16x256xf32>
    %cst_20 = arith.constant 1.000000e+00 : f32
    %41 = vector.broadcast %cst_20 : f32 to vector<16x256xf32>
    %42 = arith.subf %41, %40 : vector<16x256xf32>
    %cst_21 = arith.constant 0.000000e+00 : f32
    %43 = vector.broadcast %cst_21 : f32 to vector<16x256xf32>
    %44 = arith.maximumf %42, %43 : vector<16x256xf32>
    %45 = arith.mulf %36, %44 : vector<16x256xf32>
    %cst_22 = arith.constant 0.000000e+00 : f32
    %46 = vector.broadcast %cst_22 : f32 to vector<8x256xf32>
    %cst_23 = arith.constant 0.000000e+00 : f32
    %47 = vector.broadcast %cst_23 : f32 to vector<1x256xf32>
    %48 = arith.subf %12, %47 : vector<1x256xf32>
    %49 = math.absf %48 : vector<1x256xf32>
    %cst_24 = arith.constant 1.000000e+00 : f32
    %50 = vector.broadcast %cst_24 : f32 to vector<1x256xf32>
    %51 = arith.subf %50, %49 : vector<1x256xf32>
    %cst_25 = arith.constant 0.000000e+00 : f32
    %52 = vector.broadcast %cst_25 : f32 to vector<1x256xf32>
    %53 = arith.maximumf %51, %52 : vector<1x256xf32>
    %c0_26 = arith.constant 0 : index
    %c0_27 = arith.constant 0 : index
    %c0_28 = arith.constant 0 : index
    %54 = vector.load %arg2[%c0_26, %c0_27, %c0_28] : memref<4x8x16xf32, #tpu.memory_space<vmem>>, vector<1x8x16xf32>
    %55 = vector.shape_cast %54 : vector<1x8x16xf32> to vector<8x16xf32>
    %cst_29 = arith.constant dense<0.000000e+00> : vector<8x256xf32>
    %56 = tpu.matmul %55, %45, %cst_29 {dimension_numbers = #tpu.dot_dimension_numbers<[1], [0], [0], [1], [0, 0, 1, 1], [], []>} : vector<8x16xf32>, vector<16x256xf32>, vector<8x256xf32> -> vector<8x256xf32>
    %57 = vector.broadcast %53 : vector<1x256xf32> to vector<8x256xf32>
    %58 = arith.mulf %57, %56 : vector<8x256xf32>
    %59 = arith.addf %46, %58 : vector<8x256xf32>
    %cst_30 = arith.constant 1.000000e+00 : f32
    %60 = vector.broadcast %cst_30 : f32 to vector<1x256xf32>
    %61 = arith.subf %12, %60 : vector<1x256xf32>
    %62 = math.absf %61 : vector<1x256xf32>
    %cst_31 = arith.constant 1.000000e+00 : f32
    %63 = vector.broadcast %cst_31 : f32 to vector<1x256xf32>
    %64 = arith.subf %63, %62 : vector<1x256xf32>
    %cst_32 = arith.constant 0.000000e+00 : f32
    %65 = vector.broadcast %cst_32 : f32 to vector<1x256xf32>
    %66 = arith.maximumf %64, %65 : vector<1x256xf32>
    %c1_33 = arith.constant 1 : index
    %c0_34 = arith.constant 0 : index
    %c0_35 = arith.constant 0 : index
    %67 = vector.load %arg2[%c1_33, %c0_34, %c0_35] : memref<4x8x16xf32, #tpu.memory_space<vmem>>, vector<1x8x16xf32>
    %68 = vector.shape_cast %67 : vector<1x8x16xf32> to vector<8x16xf32>
    %cst_36 = arith.constant dense<0.000000e+00> : vector<8x256xf32>
    %69 = tpu.matmul %68, %45, %cst_36 {dimension_numbers = #tpu.dot_dimension_numbers<[1], [0], [0], [1], [0, 0, 1, 1], [], []>} : vector<8x16xf32>, vector<16x256xf32>, vector<8x256xf32> -> vector<8x256xf32>
    %70 = vector.broadcast %66 : vector<1x256xf32> to vector<8x256xf32>
    %71 = arith.mulf %70, %69 : vector<8x256xf32>
    %72 = arith.addf %59, %71 : vector<8x256xf32>
    %cst_37 = arith.constant 2.000000e+00 : f32
    %73 = vector.broadcast %cst_37 : f32 to vector<1x256xf32>
    %74 = arith.subf %12, %73 : vector<1x256xf32>
    %75 = math.absf %74 : vector<1x256xf32>
    %cst_38 = arith.constant 1.000000e+00 : f32
    %76 = vector.broadcast %cst_38 : f32 to vector<1x256xf32>
    %77 = arith.subf %76, %75 : vector<1x256xf32>
    %cst_39 = arith.constant 0.000000e+00 : f32
    %78 = vector.broadcast %cst_39 : f32 to vector<1x256xf32>
    %79 = arith.maximumf %77, %78 : vector<1x256xf32>
    %c2_40 = arith.constant 2 : index
    %c0_41 = arith.constant 0 : index
    %c0_42 = arith.constant 0 : index
    %80 = vector.load %arg2[%c2_40, %c0_41, %c0_42] : memref<4x8x16xf32, #tpu.memory_space<vmem>>, vector<1x8x16xf32>
    %81 = vector.shape_cast %80 : vector<1x8x16xf32> to vector<8x16xf32>
    %cst_43 = arith.constant dense<0.000000e+00> : vector<8x256xf32>
    %82 = tpu.matmul %81, %45, %cst_43 {dimension_numbers = #tpu.dot_dimension_numbers<[1], [0], [0], [1], [0, 0, 1, 1], [], []>} : vector<8x16xf32>, vector<16x256xf32>, vector<8x256xf32> -> vector<8x256xf32>
    %83 = vector.broadcast %79 : vector<1x256xf32> to vector<8x256xf32>
    %84 = arith.mulf %83, %82 : vector<8x256xf32>
    %85 = arith.addf %72, %84 : vector<8x256xf32>
    %cst_44 = arith.constant 3.000000e+00 : f32
    %86 = vector.broadcast %cst_44 : f32 to vector<1x256xf32>
    %87 = arith.subf %12, %86 : vector<1x256xf32>
    %88 = math.absf %87 : vector<1x256xf32>
    %cst_45 = arith.constant 1.000000e+00 : f32
    %89 = vector.broadcast %cst_45 : f32 to vector<1x256xf32>
    %90 = arith.subf %89, %88 : vector<1x256xf32>
    %cst_46 = arith.constant 0.000000e+00 : f32
    %91 = vector.broadcast %cst_46 : f32 to vector<1x256xf32>
    %92 = arith.maximumf %90, %91 : vector<1x256xf32>
    %c3 = arith.constant 3 : index
    %c0_47 = arith.constant 0 : index
    %c0_48 = arith.constant 0 : index
    %93 = vector.load %arg2[%c3, %c0_47, %c0_48] : memref<4x8x16xf32, #tpu.memory_space<vmem>>, vector<1x8x16xf32>
    %94 = vector.shape_cast %93 : vector<1x8x16xf32> to vector<8x16xf32>
    %cst_49 = arith.constant dense<0.000000e+00> : vector<8x256xf32>
    %95 = tpu.matmul %94, %45, %cst_49 {dimension_numbers = #tpu.dot_dimension_numbers<[1], [0], [0], [1], [0, 0, 1, 1], [], []>} : vector<8x16xf32>, vector<16x256xf32>, vector<8x256xf32> -> vector<8x256xf32>
    %96 = vector.broadcast %92 : vector<1x256xf32> to vector<8x256xf32>
    %97 = arith.mulf %96, %95 : vector<8x256xf32>
    %98 = arith.addf %85, %97 : vector<8x256xf32>
    %c0_50 = arith.constant 0 : index
    %c0_51 = arith.constant 0 : index
    %99 = vector.load %arg8[%c0_50, %c0_51] : memref<16x256xf32, #tpu.memory_space<vmem>>, vector<8x256xf32>
    tpu.vector_store %arg8[%c0_50, %c0_51], %98 {strides = array<i32>} : memref<16x256xf32, #tpu.memory_space<vmem>>, vector<8x256xf32>,
    %c0_52 = arith.constant 0 : index
    %c0_53 = arith.constant 0 : index
    %100 = vector.load %arg6[%c0_52, %c0_53] : memref<64x1xf32, #tpu.memory_space<vmem>>, vector<64x1xf32>
    %c0_54 = arith.constant 0 : index
    %c0_55 = arith.constant 0 : index
    %101 = vector.load %arg7[%c0_54, %c0_55] : memref<64x1xf32, #tpu.memory_space<vmem>>, vector<64x1xf32>
    %cst_56 = arith.constant 1.000000e+00 : f32
    %102 = vector.broadcast %cst_56 : f32 to vector<1x256xf32>
    %103 = arith.addf %0, %102 : vector<1x256xf32>
    %cst_57 = arith.constant 3.500000e+00 : f32
    %104 = vector.broadcast %cst_57 : f32 to vector<1x256xf32>
    %105 = arith.mulf %103, %104 : vector<1x256xf32>
    %cst_58 = arith.constant 0.000000e+00 : f32
    %cst_59 = arith.constant 7.000000e+00 : f32
    %106 = vector.broadcast %cst_58 : f32 to vector<1x256xf32>
    %107 = arith.maximumf %106, %105 : vector<1x256xf32>
    %108 = vector.broadcast %cst_59 : f32 to vector<1x256xf32>
    %109 = arith.minimumf %108, %107 : vector<1x256xf32>
    %cst_60 = arith.constant 1.000000e+00 : f32
    %110 = vector.broadcast %cst_60 : f32 to vector<1x256xf32>
    %111 = arith.addf %1, %110 : vector<1x256xf32>
    %cst_61 = arith.constant 3.500000e+00 : f32
    %112 = vector.broadcast %cst_61 : f32 to vector<1x256xf32>
    %113 = arith.mulf %111, %112 : vector<1x256xf32>
    %cst_62 = arith.constant 0.000000e+00 : f32
    %cst_63 = arith.constant 7.000000e+00 : f32
    %114 = vector.broadcast %cst_62 : f32 to vector<1x256xf32>
    %115 = arith.maximumf %114, %113 : vector<1x256xf32>
    %116 = vector.broadcast %cst_63 : f32 to vector<1x256xf32>
    %117 = arith.minimumf %116, %115 : vector<1x256xf32>
    %cst_64 = arith.constant 1.000000e+00 : f32
    %118 = vector.broadcast %cst_64 : f32 to vector<1x256xf32>
    %119 = arith.addf %2, %118 : vector<1x256xf32>
    %cst_65 = arith.constant 3.500000e+00 : f32
    %120 = vector.broadcast %cst_65 : f32 to vector<1x256xf32>
    %121 = arith.mulf %119, %120 : vector<1x256xf32>
    %cst_66 = arith.constant 0.000000e+00 : f32
    %cst_67 = arith.constant 7.000000e+00 : f32
    %122 = vector.broadcast %cst_66 : f32 to vector<1x256xf32>
    %123 = arith.maximumf %122, %121 : vector<1x256xf32>
    %124 = vector.broadcast %cst_67 : f32 to vector<1x256xf32>
    %125 = arith.minimumf %124, %123 : vector<1x256xf32>
    %126 = vector.broadcast %117 : vector<1x256xf32> to vector<64x256xf32>
    %127 = vector.broadcast %100 : vector<64x1xf32> to vector<64x256xf32>
    %128 = arith.subf %126, %127 : vector<64x256xf32>
    %129 = math.absf %128 : vector<64x256xf32>
    %cst_68 = arith.constant 1.000000e+00 : f32
    %130 = vector.broadcast %cst_68 : f32 to vector<64x256xf32>
    %131 = arith.subf %130, %129 : vector<64x256xf32>
    %cst_69 = arith.constant 0.000000e+00 : f32
    %132 = vector.broadcast %cst_69 : f32 to vector<64x256xf32>
    %133 = arith.maximumf %131, %132 : vector<64x256xf32>
    %134 = vector.broadcast %125 : vector<1x256xf32> to vector<64x256xf32>
    %135 = vector.broadcast %101 : vector<64x1xf32> to vector<64x256xf32>
    %136 = arith.subf %134, %135 : vector<64x256xf32>
    %137 = math.absf %136 : vector<64x256xf32>
    %cst_70 = arith.constant 1.000000e+00 : f32
    %138 = vector.broadcast %cst_70 : f32 to vector<64x256xf32>
    %139 = arith.subf %138, %137 : vector<64x256xf32>
    %cst_71 = arith.constant 0.000000e+00 : f32
    %140 = vector.broadcast %cst_71 : f32 to vector<64x256xf32>
    %141 = arith.maximumf %139, %140 : vector<64x256xf32>
    %142 = arith.mulf %133, %141 : vector<64x256xf32>
    %cst_72 = arith.constant 0.000000e+00 : f32
    %143 = vector.broadcast %cst_72 : f32 to vector<8x256xf32>
    %cst_73 = arith.constant 0.000000e+00 : f32
    %144 = vector.broadcast %cst_73 : f32 to vector<1x256xf32>
    %145 = arith.subf %109, %144 : vector<1x256xf32>
    %146 = math.absf %145 : vector<1x256xf32>
    %cst_74 = arith.constant 1.000000e+00 : f32
    %147 = vector.broadcast %cst_74 : f32 to vector<1x256xf32>
    %148 = arith.subf %147, %146 : vector<1x256xf32>
    %cst_75 = arith.constant 0.000000e+00 : f32
    %149 = vector.broadcast %cst_75 : f32 to vector<1x256xf32>
    %150 = arith.maximumf %148, %149 : vector<1x256xf32>
    %c0_76 = arith.constant 0 : index
    %c0_77 = arith.constant 0 : index
    %c0_78 = arith.constant 0 : index
    %151 = vector.load %arg5[%c0_76, %c0_77, %c0_78] : memref<8x8x64xf32, #tpu.memory_space<vmem>>, vector<1x8x64xf32>
    %152 = vector.shape_cast %151 : vector<1x8x64xf32> to vector<8x64xf32>
    %cst_79 = arith.constant dense<0.000000e+00> : vector<8x256xf32>
    %153 = tpu.matmul %152, %142, %cst_79 {dimension_numbers = #tpu.dot_dimension_numbers<[1], [0], [0], [1], [0, 0, 1, 1], [], []>} : vector<8x64xf32>, vector<64x256xf32>, vector<8x256xf32> -> vector<8x256xf32>
    %154 = vector.broadcast %150 : vector<1x256xf32> to vector<8x256xf32>
    %155 = arith.mulf %154, %153 : vector<8x256xf32>
    %156 = arith.addf %143, %155 : vector<8x256xf32>
    %cst_80 = arith.constant 1.000000e+00 : f32
    %157 = vector.broadcast %cst_80 : f32 to vector<1x256xf32>
    %158 = arith.subf %109, %157 : vector<1x256xf32>
    %159 = math.absf %158 : vector<1x256xf32>
    %cst_81 = arith.constant 1.000000e+00 : f32
    %160 = vector.broadcast %cst_81 : f32 to vector<1x256xf32>
    %161 = arith.subf %160, %159 : vector<1x256xf32>
    %cst_82 = arith.constant 0.000000e+00 : f32
    %162 = vector.broadcast %cst_82 : f32 to vector<1x256xf32>
    %163 = arith.maximumf %161, %162 : vector<1x256xf32>
    %c1_83 = arith.constant 1 : index
    %c0_84 = arith.constant 0 : index
    %c0_85 = arith.constant 0 : index
    %164 = vector.load %arg5[%c1_83, %c0_84, %c0_85] : memref<8x8x64xf32, #tpu.memory_space<vmem>>, vector<1x8x64xf32>
    %165 = vector.shape_cast %164 : vector<1x8x64xf32> to vector<8x64xf32>
    %cst_86 = arith.constant dense<0.000000e+00> : vector<8x256xf32>
    %166 = tpu.matmul %165, %142, %cst_86 {dimension_numbers = #tpu.dot_dimension_numbers<[1], [0], [0], [1], [0, 0, 1, 1], [], []>} : vector<8x64xf32>, vector<64x256xf32>, vector<8x256xf32> -> vector<8x256xf32>
    %167 = vector.broadcast %163 : vector<1x256xf32> to vector<8x256xf32>
    %168 = arith.mulf %167, %166 : vector<8x256xf32>
    %169 = arith.addf %156, %168 : vector<8x256xf32>
    %cst_87 = arith.constant 2.000000e+00 : f32
    %170 = vector.broadcast %cst_87 : f32 to vector<1x256xf32>
    %171 = arith.subf %109, %170 : vector<1x256xf32>
    %172 = math.absf %171 : vector<1x256xf32>
    %cst_88 = arith.constant 1.000000e+00 : f32
    %173 = vector.broadcast %cst_88 : f32 to vector<1x256xf32>
    %174 = arith.subf %173, %172 : vector<1x256xf32>
    %cst_89 = arith.constant 0.000000e+00 : f32
    %175 = vector.broadcast %cst_89 : f32 to vector<1x256xf32>
    %176 = arith.maximumf %174, %175 : vector<1x256xf32>
    %c2_90 = arith.constant 2 : index
    %c0_91 = arith.constant 0 : index
    %c0_92 = arith.constant 0 : index
    %177 = vector.load %arg5[%c2_90, %c0_91, %c0_92] : memref<8x8x64xf32, #tpu.memory_space<vmem>>, vector<1x8x64xf32>
    %178 = vector.shape_cast %177 : vector<1x8x64xf32> to vector<8x64xf32>
    %cst_93 = arith.constant dense<0.000000e+00> : vector<8x256xf32>
    %179 = tpu.matmul %178, %142, %cst_93 {dimension_numbers = #tpu.dot_dimension_numbers<[1], [0], [0], [1], [0, 0, 1, 1], [], []>} : vector<8x64xf32>, vector<64x256xf32>, vector<8x256xf32> -> vector<8x256xf32>
    %180 = vector.broadcast %176 : vector<1x256xf32> to vector<8x256xf32>
    %181 = arith.mulf %180, %179 : vector<8x256xf32>
    %182 = arith.addf %169, %181 : vector<8x256xf32>
    %cst_94 = arith.constant 3.000000e+00 : f32
    %183 = vector.broadcast %cst_94 : f32 to vector<1x256xf32>
    %184 = arith.subf %109, %183 : vector<1x256xf32>
    %185 = math.absf %184 : vector<1x256xf32>
    %cst_95 = arith.constant 1.000000e+00 : f32
    %186 = vector.broadcast %cst_95 : f32 to vector<1x256xf32>
    %187 = arith.subf %186, %185 : vector<1x256xf32>
    %cst_96 = arith.constant 0.000000e+00 : f32
    %188 = vector.broadcast %cst_96 : f32 to vector<1x256xf32>
    %189 = arith.maximumf %187, %188 : vector<1x256xf32>
    %c3_97 = arith.constant 3 : index
    %c0_98 = arith.constant 0 : index
    %c0_99 = arith.constant 0 : index
    %190 = vector.load %arg5[%c3_97, %c0_98, %c0_99] : memref<8x8x64xf32, #tpu.memory_space<vmem>>, vector<1x8x64xf32>
    %191 = vector.shape_cast %190 : vector<1x8x64xf32> to vector<8x64xf32>
    %cst_100 = arith.constant dense<0.000000e+00> : vector<8x256xf32>
    %192 = tpu.matmul %191, %142, %cst_100 {dimension_numbers = #tpu.dot_dimension_numbers<[1], [0], [0], [1], [0, 0, 1, 1], [], []>} : vector<8x64xf32>, vector<64x256xf32>, vector<8x256xf32> -> vector<8x256xf32>
    %193 = vector.broadcast %189 : vector<1x256xf32> to vector<8x256xf32>
    %194 = arith.mulf %193, %192 : vector<8x256xf32>
    %195 = arith.addf %182, %194 : vector<8x256xf32>
    %cst_101 = arith.constant 4.000000e+00 : f32
    %196 = vector.broadcast %cst_101 : f32 to vector<1x256xf32>
    %197 = arith.subf %109, %196 : vector<1x256xf32>
    %198 = math.absf %197 : vector<1x256xf32>
    %cst_102 = arith.constant 1.000000e+00 : f32
    %199 = vector.broadcast %cst_102 : f32 to vector<1x256xf32>
    %200 = arith.subf %199, %198 : vector<1x256xf32>
    %cst_103 = arith.constant 0.000000e+00 : f32
    %201 = vector.broadcast %cst_103 : f32 to vector<1x256xf32>
    %202 = arith.maximumf %200, %201 : vector<1x256xf32>
    %c4 = arith.constant 4 : index
    %c0_104 = arith.constant 0 : index
    %c0_105 = arith.constant 0 : index
    %203 = vector.load %arg5[%c4, %c0_104, %c0_105] : memref<8x8x64xf32, #tpu.memory_space<vmem>>, vector<1x8x64xf32>
    %204 = vector.shape_cast %203 : vector<1x8x64xf32> to vector<8x64xf32>
    %cst_106 = arith.constant dense<0.000000e+00> : vector<8x256xf32>
    %205 = tpu.matmul %204, %142, %cst_106 {dimension_numbers = #tpu.dot_dimension_numbers<[1], [0], [0], [1], [0, 0, 1, 1], [], []>} : vector<8x64xf32>, vector<64x256xf32>, vector<8x256xf32> -> vector<8x256xf32>
    %206 = vector.broadcast %202 : vector<1x256xf32> to vector<8x256xf32>
    %207 = arith.mulf %206, %205 : vector<8x256xf32>
    %208 = arith.addf %195, %207 : vector<8x256xf32>
    %cst_107 = arith.constant 5.000000e+00 : f32
    %209 = vector.broadcast %cst_107 : f32 to vector<1x256xf32>
    %210 = arith.subf %109, %209 : vector<1x256xf32>
    %211 = math.absf %210 : vector<1x256xf32>
    %cst_108 = arith.constant 1.000000e+00 : f32
    %212 = vector.broadcast %cst_108 : f32 to vector<1x256xf32>
    %213 = arith.subf %212, %211 : vector<1x256xf32>
    %cst_109 = arith.constant 0.000000e+00 : f32
    %214 = vector.broadcast %cst_109 : f32 to vector<1x256xf32>
    %215 = arith.maximumf %213, %214 : vector<1x256xf32>
    %c5 = arith.constant 5 : index
    %c0_110 = arith.constant 0 : index
    %c0_111 = arith.constant 0 : index
    %216 = vector.load %arg5[%c5, %c0_110, %c0_111] : memref<8x8x64xf32, #tpu.memory_space<vmem>>, vector<1x8x64xf32>
    %217 = vector.shape_cast %216 : vector<1x8x64xf32> to vector<8x64xf32>
    %cst_112 = arith.constant dense<0.000000e+00> : vector<8x256xf32>
    %218 = tpu.matmul %217, %142, %cst_112 {dimension_numbers = #tpu.dot_dimension_numbers<[1], [0], [0], [1], [0, 0, 1, 1], [], []>} : vector<8x64xf32>, vector<64x256xf32>, vector<8x256xf32> -> vector<8x256xf32>
    %219 = vector.broadcast %215 : vector<1x256xf32> to vector<8x256xf32>
    %220 = arith.mulf %219, %218 : vector<8x256xf32>
    %221 = arith.addf %208, %220 : vector<8x256xf32>
    %cst_113 = arith.constant 6.000000e+00 : f32
    %222 = vector.broadcast %cst_113 : f32 to vector<1x256xf32>
    %223 = arith.subf %109, %222 : vector<1x256xf32>
    %224 = math.absf %223 : vector<1x256xf32>
    %cst_114 = arith.constant 1.000000e+00 : f32
    %225 = vector.broadcast %cst_114 : f32 to vector<1x256xf32>
    %226 = arith.subf %225, %224 : vector<1x256xf32>
    %cst_115 = arith.constant 0.000000e+00 : f32
    %227 = vector.broadcast %cst_115 : f32 to vector<1x256xf32>
    %228 = arith.maximumf %226, %227 : vector<1x256xf32>
    %c6 = arith.constant 6 : index
    %c0_116 = arith.constant 0 : index
    %c0_117 = arith.constant 0 : index
    %229 = vector.load %arg5[%c6, %c0_116, %c0_117] : memref<8x8x64xf32, #tpu.memory_space<vmem>>, vector<1x8x64xf32>
    %230 = vector.shape_cast %229 : vector<1x8x64xf32> to vector<8x64xf32>
    %cst_118 = arith.constant dense<0.000000e+00> : vector<8x256xf32>
    %231 = tpu.matmul %230, %142, %cst_118 {dimension_numbers = #tpu.dot_dimension_numbers<[1], [0], [0], [1], [0, 0, 1, 1], [], []>} : vector<8x64xf32>, vector<64x256xf32>, vector<8x256xf32> -> vector<8x256xf32>
    %232 = vector.broadcast %228 : vector<1x256xf32> to vector<8x256xf32>
    %233 = arith.mulf %232, %231 : vector<8x256xf32>
    %234 = arith.addf %221, %233 : vector<8x256xf32>
    %cst_119 = arith.constant 7.000000e+00 : f32
    %235 = vector.broadcast %cst_119 : f32 to vector<1x256xf32>
    %236 = arith.subf %109, %235 : vector<1x256xf32>
    %237 = math.absf %236 : vector<1x256xf32>
    %cst_120 = arith.constant 1.000000e+00 : f32
    %238 = vector.broadcast %cst_120 : f32 to vector<1x256xf32>
    %239 = arith.subf %238, %237 : vector<1x256xf32>
    %cst_121 = arith.constant 0.000000e+00 : f32
    %240 = vector.broadcast %cst_121 : f32 to vector<1x256xf32>
    %241 = arith.maximumf %239, %240 : vector<1x256xf32>
    %c7 = arith.constant 7 : index
    %c0_122 = arith.constant 0 : index
    %c0_123 = arith.constant 0 : index
    %242 = vector.load %arg5[%c7, %c0_122, %c0_123] : memref<8x8x64xf32, #tpu.memory_space<vmem>>, vector<1x8x64xf32>
    %243 = vector.shape_cast %242 : vector<1x8x64xf32> to vector<8x64xf32>
    %cst_124 = arith.constant dense<0.000000e+00> : vector<8x256xf32>
    %244 = tpu.matmul %243, %142, %cst_124 {dimension_numbers = #tpu.dot_dimension_numbers<[1], [0], [0], [1], [0, 0, 1, 1], [], []>} : vector<8x64xf32>, vector<64x256xf32>, vector<8x256xf32> -> vector<8x256xf32>
    %245 = vector.broadcast %241 : vector<1x256xf32> to vector<8x256xf32>
    %246 = arith.mulf %245, %244 : vector<8x256xf32>
    %247 = arith.addf %234, %246 : vector<8x256xf32>
    %c8 = arith.constant 8 : index
    %c0_125 = arith.constant 0 : index
    %248 = vector.load %arg8[%c8, %c0_125] : memref<16x256xf32, #tpu.memory_space<vmem>>, vector<8x256xf32>
    tpu.vector_store %arg8[%c8, %c0_125], %247 {strides = array<i32>} : memref<16x256xf32, #tpu.memory_space<vmem>>, vector<8x256xf32>,
    return
  }
  func.func @transform_0(%arg0: i32) -> (i32, i32) {
    %c0_i32 = arith.constant 0 : i32
    %c0_i32_0 = arith.constant 0 : i32
    return %c0_i32, %arg0 : i32, i32
  }
  func.func @transform_1(%arg0: i32) -> (i32, i32, i32) {
    %c0_i32 = arith.constant 0 : i32
    %c0_i32_0 = arith.constant 0 : i32
    %c0_i32_1 = arith.constant 0 : i32
    %c0_i32_2 = arith.constant 0 : i32
    return %c0_i32, %c0_i32_0, %c0_i32_1 : i32, i32, i32
  }
  func.func @transform_2(%arg0: i32) -> (i32, i32) {
    %c0_i32 = arith.constant 0 : i32
    %c0_i32_0 = arith.constant 0 : i32
    %c0_i32_1 = arith.constant 0 : i32
    return %c0_i32, %c0_i32_0 : i32, i32
  }
  func.func @transform_3(%arg0: i32) -> (i32, i32) {
    %c0_i32 = arith.constant 0 : i32
    %c0_i32_0 = arith.constant 0 : i32
    %c0_i32_1 = arith.constant 0 : i32
    return %c0_i32, %c0_i32_0 : i32, i32
  }
  func.func @transform_4(%arg0: i32) -> (i32, i32, i32) {
    %c0_i32 = arith.constant 0 : i32
    %c0_i32_0 = arith.constant 0 : i32
    %c0_i32_1 = arith.constant 0 : i32
    %c0_i32_2 = arith.constant 0 : i32
    return %c0_i32, %c0_i32_0, %c0_i32_1 : i32, i32, i32
  }
  func.func @transform_5(%arg0: i32) -> (i32, i32) {
    %c0_i32 = arith.constant 0 : i32
    %c0_i32_0 = arith.constant 0 : i32
    %c0_i32_1 = arith.constant 0 : i32
    return %c0_i32, %c0_i32_0 : i32, i32
  }
  func.func @transform_6(%arg0: i32) -> (i32, i32) {
    %c0_i32 = arith.constant 0 : i32
    %c0_i32_0 = arith.constant 0 : i32
    %c0_i32_1 = arith.constant 0 : i32
    return %c0_i32, %c0_i32_0 : i32, i32
  }
  func.func @transform_7(%arg0: i32) -> (i32, i32) {
    %c0_i32 = arith.constant 0 : i32
    %c0_i32_0 = arith.constant 0 : i32
    return %c0_i32, %arg0 : i32, i32
  }
}

</mosaic_0001>

<bundles_post_ra>
// kernel: _dense_grid_forward_packed.1
= control target key start
LH: loop header
LB: loop body
LE: loop exit
PB: predicated region body
PF: predicated region fallthrough
CT: control target
= control target key end

     0   :  { %v1724_v0 = vmov 0   ;;  %v1725_v17 = vmov 0.0   ;;  %v48_v26 = vlaneseq  ;;  %vm129_vm0 = vcmask 130048   ;;  %s2063_s3 = inlined_call_operand.vmem [shape: f32[16,1], index: 3, kind: input, shape index: {}]   ;;  %s2064_s2 = inlined_call_operand.vmem [shape: f32[16,1], index: 2, kind: input, shape index: {}]   ;;  %s2065_s5 = inlined_call_operand.vmem [shape: f32[64,1], index: 5, kind: input, shape index: {}]   ;;  %s2066_s6 = inlined_call_operand.vmem [shape: f32[64,1], index: 6, kind: input, shape index: {}]   ;;  %s2067_s0 = inlined_call_operand.vmem [shape: f32[3,256], index: 0, kind: input, shape index: {}]   ;;  %s2068_s1 = inlined_call_operand.vmem [shape: f32[4,8,16], index: 1, kind: input, shape index: {}]   ;;  %s2069_s4 = inlined_call_operand.vmem [shape: f32[8,8,64], index: 4, kind: input, shape index: {}]   ;;  %s2070_s7 = inlined_call_operand.vmem [shape: f32[16,256], index: 7, kind: output, shape index: {}]  }
   0x1   :  { %1723 = vset.pattern.permute.xlu1 %v1724_v0  ;;  %1722 = vset.pattern.permute.xlu0 %v1724_v0  ;;  %v33_v1 = vld [vmem:[%s2063_s3] sm:$0xff]  ;;  %v34_v3 = vld [vmem:[%s2063_s3 + $0x8] sm:$0xff]  ;;  %v509_v9 = vld [vmem:[%s2065_s5 + $0x18] sm:$0xff]  ;;  %vm781_vm1 = vcmask 523264  }
   0x2   :  { %v31_v2 = vld [vmem:[%s2064_s2] sm:$0xff]  ;;  %97 = vperm.xlu1 %1723, %v33_v1   ;;  %v32_v4 = vld [vmem:[%s2064_s2 + $0x8] sm:$0xff]  ;;  %v508_v10 = vld [vmem:[%s2065_s5 + $0x10] sm:$0xff]  ;;  %197 = vmatprep.mubr.f32.mxu0 %v1725_v17  ;;  %v49_v29 = vshrl.u32 %v48_v26, 7 }
   0x3   :  { %60 = vperm.xlu0 %1722, %v31_v2   ;;  %v507_v5 = vld [vmem:[%s2065_s5 + $0x8] sm:$0xff]  ;;  %v506_v6 = vld [vmem:[%s2065_s5] sm:$0xff]  ;;  %v517_v11 = vld [vmem:[%s2066_s6 + $0x18] sm:$0xff]  ;;  %292 = vmatprep.mubr.f32.mxu1 %v1725_v17 }
   0x4   :  { %v515_v7 = vld [vmem:[%s2066_s6 + $0x8] sm:$0xff]  ;;  %v514_v8 = vld [vmem:[%s2066_s6] sm:$0xff]  ;;  %v516_v12 = vld [vmem:[%s2066_s6 + $0x10] sm:$0xff]  ;;  %v1834_v33 = vsub.s32 0, %v49_v29  ;;  %v1836_v34 = vsub.s32 1, %v49_v29 }
   0x5   :  { %v511_v13 = vld [vmem:[%s2065_s5 + $0x28] sm:$0xff]  ;;  %v510_v14 = vld [vmem:[%s2065_s5 + $0x20] sm:$0xff]  ;;  %v513_v18 = vld [vmem:[%s2065_s5 + $0x38] sm:$0xff] }
   0x6   :  { %102 = vperm.xlu1 %1723, %v34_v3   ;;  %v519_v15 = vld [vmem:[%s2066_s6 + $0x28] sm:$0xff]  ;;  %v518_v16 = vld [vmem:[%s2066_s6 + $0x20] sm:$0xff]  ;;  %v512_v19 = vld [vmem:[%s2065_s5 + $0x30] sm:$0xff] }
   0x7   :  { %65 = vperm.xlu0 %1722, %v32_v4   ;;  %v521_v20 = vld [vmem:[%s2066_s6 + $0x38] sm:$0xff]  ;;  %v520_v21 = vld [vmem:[%s2066_s6 + $0x30] sm:$0xff]  ;;  %v1543_v22 = vld [vmem:[%s2067_s0 + $0x2] ss:$4 sm:$0x3] }
   0x8   :  { %v1542_v23 = vld [vmem:[%s2067_s0 + $0x1] ss:$4 sm:$0x3]  ;;  %v43_v24 = vadd.f32 1.0, %v1543_v22 }
   0x9   :  { %v39_v25 = vadd.f32 1.0, %v1542_v23 }
   0xa   :  { %549 = vperm.xlu1 %1723, %v507_v5   ;;  %v44_v27 = vmul.f32 1.5, %v43_v24  ;;  %v528_v37 = vmul.f32 3.5, %v43_v24 }
   0xb   :  { %544 = vperm.xlu0 %1722, %v506_v6   ;;  %v40_v28 = vmul.f32 1.5, %v39_v25  ;;  %v525_v32 = vmul.f32 3.5, %v39_v25 }
   0xc   :  { %v45_v30 = vmax.f32 %v44_v27, 0.0  ;;  %v529_v43 = vmax.f32 %v528_v37, 0.0 }
   0xd   :  { %v41_v31 = vmax.f32 %v40_v28, 0.0  ;;  %v526_v38 = vmax.f32 %v525_v32, 0.0 }
   0xe   :  { %664 = vperm.xlu1 %1723, %v515_v7   ;;  %v46_v35 = vmin.f32 %v45_v30, 3.0  ;;  %v530_v51 = vmin.f32 %v529_v43, 7.0 }
   0xf   :  { %659 = vperm.xlu0 %1722, %v514_v8   ;;  %v42_v36 = vmin.f32 %v41_v31, 3.0  ;;  %v527_v46 = vmin.f32 %v526_v38, 7.0 }
  0x10   :  { %v88_v39 = vrot.slane %v46_v35, %v1834_v33  ;;  %v92_v40 = vrot.slane %v46_v35, %v1836_v34  ;;  %v1849_v4 = vrot.slane %v530_v51, %v1834_v33  ;;  %v1852_v5 = vrot.slane %v530_v51, %v1836_v34 }
  0x11   :  { %v51_v41 = vrot.slane %v42_v36, %v1834_v33  ;;  %v55_v42 = vrot.slane %v42_v36, %v1836_v34  ;;  %v1843_v56 = vrot.slane %v527_v46, %v1834_v33  ;;  %v1846_v57 = vrot.slane %v527_v46, %v1836_v34 }
  0x12   :  { %559 = vperm.xlu1 %1723, %v509_v9  }
  0x13   :  { %554 = vperm.xlu0 %1722, %v508_v10  }
  0x16   :  { %674 = vperm.xlu1 %1723, %v517_v11  }
  0x17   :  { %669 = vperm.xlu0 %1722, %v516_v12  }
  0x1a   :  { %569 = vperm.xlu1 %1723, %v511_v13  }
  0x1b   :  { %564 = vperm.xlu0 %1722, %v510_v14  }
  0x1e   :  { %684 = vperm.xlu1 %1723, %v519_v15  }
  0x1f   :  { %679 = vperm.xlu0 %1722, %v518_v16  }
  0x22   :  { %579 = vperm.xlu1 %1723, %v513_v18  }
  0x23   :  { %574 = vperm.xlu0 %1722, %v512_v19  }
  0x26   :  { %694 = vperm.xlu1 %1723, %v521_v20  }
  0x27   :  { %689 = vperm.xlu0 %1722, %v520_v21  }
  0x81   :  { %v98_v44 = vpop.permute.xlu1 %97 }
  0x82   :  { %v61_v45 = vpop.permute.xlu0 %60  ;;  %v105_v47 = vsub.f32 %v88_v39, %v98_v44  ;;  %v106_v48 = vsub.f32 %v92_v40, %v98_v44 }
  0x83   :  { %v68_v49 = vsub.f32 %v51_v41, %v61_v45  ;;  %v69_v50 = vsub.f32 %v55_v42, %v61_v45 }
  0x84   :  { %v109_v52 = vand.u32 2147483647, %v105_v47  ;;  %v110_v53 = vand.u32 2147483647, %v106_v48 }
  0x85   :  { %v72_v54 = vand.u32 2147483647, %v68_v49  ;;  %v73_v55 = vand.u32 2147483647, %v69_v50  ;;  %v103_v58 = vpop.permute.xlu1 %102 }
  0x86   :  { %v66_v59 = vpop.permute.xlu0 %65  ;;  %v113_v60 = vsub.f32 1.0, %v109_v52  ;;  %v114_v61 = vsub.f32 1.0, %v110_v53  ;;  %v107_v63 = vsub.f32 %v88_v39, %v103_v58  ;;  %v108_v1 = vsub.f32 %v92_v40, %v103_v58 }
  0x87   :  { %v76_v62 = vsub.f32 1.0, %v72_v54  ;;  %v77_v0 = vsub.f32 1.0, %v73_v55  ;;  %v70_v2 = vsub.f32 %v51_v41, %v66_v59  ;;  %v71_v3 = vsub.f32 %v55_v42, %v66_v59 }
  0x88   :  { %v111_v6 = vand.u32 2147483647, %v107_v63  ;;  %v117_v7 = vmax.f32 %v113_v60, 0.0  ;;  %v118_v8 = vmax.f32 %v114_v61, 0.0  ;;  %v112_v9 = vand.u32 2147483647, %v108_v1 }
  0x89   :  { %v74_v10 = vand.u32 2147483647, %v70_v2  ;;  %v550_v11 = vpop.permute.xlu1 %549  ;;  %v80_v13 = vmax.f32 %v76_v62, 0.0  ;;  %v75_v15 = vand.u32 2147483647, %v71_v3  ;;  %v81_v18 = vmax.f32 %v77_v0, 0.0 }
  0x8a   :  { %v545_v12 = vpop.permute.xlu0 %544  ;;  %v115_v14 = vsub.f32 1.0, %v111_v6  ;;  %v584_v16 = vsub.f32 %v1843_v56, %v550_v11  ;;  %v116_v19 = vsub.f32 1.0, %v112_v9  ;;  %v585_v21 = vsub.f32 %v1846_v57, %v550_v11  ;;  %v128_v0 = vld [vmem:[%s2068_s1] sm:$0xff]  ;;  %v1546_v9 = vld [vmem:[%s2068_s1 + $0x8] sm:$0xff] }
  0x8b   :  { %v78_v20 = vsub.f32 1.0, %v74_v10  ;;  %v79_v23 = vsub.f32 1.0, %v75_v15  ;;  %v582_v25 = vsub.f32 %v1843_v56, %v545_v12  ;;  %v583_v29 = vsub.f32 %v1846_v57, %v545_v12 }
  0x8c   :  { %v119_v22 = vmax.f32 %v115_v14, 0.0  ;;  %v600_v24 = vand.u32 2147483647, %v584_v16  ;;  %v120_v26 = vmax.f32 %v116_v19, 0.0  ;;  %v601_v28 = vand.u32 2147483647, %v585_v21 }
  0x8d   :  { %v82_v27 = vmax.f32 %v78_v20, 0.0  ;;  %v665_v30 = vpop.permute.xlu1 %664  ;;  %v83_v32 = vmax.f32 %v79_v23, 0.0  ;;  %v598_v35 = vand.u32 2147483647, %v582_v25  ;;  %v121_v37 = vmul.f32 %v117_v7, %v80_v13 }
  0x8e   :  { %v660_v31 = vpop.permute.xlu0 %659  ;;  %v699_v36 = vsub.f32 %v1849_v4, %v665_v30  ;;  %v599_v39 = vand.u32 2147483647, %v583_v29  ;;  %v700_v40 = vsub.f32 %v1852_v5, %v665_v30  ;;  %v122_v41 = vmul.f32 %v118_v8, %v81_v18  ;;  %v1549_v29 = vld [vmem:[%s2068_s1 + $0x10] sm:$0xff]  ;;  %v1552_v30 = vld [vmem:[%s2068_s1 + $0x18] sm:$0xff] }
  0x8f   :  { %v123_v38 = vmul.f32 %v119_v22, %v82_v27  ;;  %v124_v42 = vmul.f32 %v120_v26, %v83_v32  ;;  %v616_v45 = vsub.f32 1.0, %v600_v24  ;;  %v617_v46 = vsub.f32 1.0, %v601_v28 }
  0x90   :  { %v715_v43 = vand.u32 2147483647, %v699_v36  ;;  %v716_v47 = vand.u32 2147483647, %v700_v40  ;;  %v614_v51 = vsub.f32 1.0, %v598_v35  ;;  %v697_v53 = vsub.f32 %v1849_v4, %v660_v31 }
  0x91   :  { %v1578_v44 = vpack.c.bf16 %v123_v38, %v121_v37  ;;  %v560_v48 = vpop.permute.xlu1 %559  ;;  %v1576_v50 = vpack.c.bf16 %v124_v42, %v122_v41  ;;  %v615_v54 = vsub.f32 1.0, %v599_v39  ;;  %v698_v58 = vsub.f32 %v1852_v5, %v660_v31 }
  0x92   :  { %v555_v49 = vpop.permute.xlu0 %554  ;;  %v731_v52 = vsub.f32 1.0, %v715_v43  ;;  %v732_v55 = vsub.f32 1.0, %v716_v47  ;;  %v588_v59 = vsub.f32 %v1843_v56, %v560_v48  ;;  %v713_v61 = vand.u32 2147483647, %v697_v53 }
  0x93   :  { %v589_v62 = vsub.f32 %v1846_v57, %v560_v48  ;;  %v586_v63 = vsub.f32 %v1843_v56, %v555_v49  ;;  %1577 = vmatprep.subr.bf16.mxu0 %v1576_v50  ;;  %1581 = vmatprep.subr.bf16.mxu1 %v1576_v50  ;;  %v714_v2 = vand.u32 2147483647, %v698_v58  ;;  %v587_v6 = vsub.f32 %v1846_v57, %v555_v49 }
  0x94   :  { %v747_v60 = vmax.f32 %v731_v52, 0.0  ;;  %v748_v1 = vmax.f32 %v732_v55, 0.0  ;;  %v604_v3 = vand.u32 2147483647, %v588_v59  ;;  %1579 = vmatpush1.bf16.msra.mxu0 %v1578_v44  ;;  %1583 = vmatpush1.bf16.msra.mxu1 %v1578_v44  ;;  %v632_v10 = vmax.f32 %v616_v45, 0.0 }
  0x95   :  { %v675_v7 = vpop.permute.xlu1 %674  ;;  %v729_v11 = vsub.f32 1.0, %v713_v61  ;;  %v605_v12 = vand.u32 2147483647, %v589_v62  ;;  %v602_v13 = vand.u32 2147483647, %v586_v63  ;;  %1585 = vmatprep.subr.bf16.mxu0 %v1576_v50  ;;  %1589 = vmatprep.subr.bf16.mxu1 %v1576_v50  ;;  %v633_v14 = vmax.f32 %v617_v46, 0.0 }
  0x96   :  { %v670_v8 = vpop.permute.xlu0 %669  ;;  %v630_v15 = vmax.f32 %v614_v51, 0.0  ;;  %v730_v16 = vsub.f32 1.0, %v714_v2  ;;  %v620_v18 = vsub.f32 1.0, %v604_v3  ;;  %v631_v19 = vmax.f32 %v615_v54, 0.0 }
  0x97   :  { %v763_v20 = vmul.f32 %v747_v60, %v632_v10  ;;  %v745_v21 = vmax.f32 %v729_v11, 0.0  ;;  %v703_v22 = vsub.f32 %v1849_v4, %v675_v7  ;;  %1544 = vmatmul.mubr.msk.f32.vlgmr.msra.gmra.mrb[0].mxu0 %vm129_vm0, %v128_v0  ;;  %1547 = vmatmul.mubr.msk.f32.vlgmr.msra.gmra.mrb[0].mxu1 %vm129_vm0, %v1546_v9  ;;  %v764_v23 = vmul.f32 %v748_v1, %v633_v14 }
  0x98   :  { %v746_v24 = vmax.f32 %v730_v16, 0.0  ;;  %v603_v25 = vand.u32 2147483647, %v587_v6  ;;  %v704_v26 = vsub.f32 %v1852_v5, %v675_v7  ;;  %1587 = vmatpush1.bf16.msra.mxu0 %v1578_v44  ;;  %1591 = vmatpush1.bf16.msra.mxu1 %v1578_v44  ;;  %v621_v32 = vsub.f32 1.0, %v605_v12 }
  0x99   :  { %v570_v27 = vpop.permute.xlu1 %569  ;;  %v761_v31 = vmul.f32 %v745_v21, %v630_v15  ;;  %v618_v35 = vsub.f32 1.0, %v602_v13  ;;  %v719_v36 = vand.u32 2147483647, %v703_v22  ;;  %387 = vmatprep.mubr.f32.mxu0 %v1725_v17  ;;  %482 = vmatprep.mubr.f32.mxu1 %v1725_v17  ;;  %v636_v38 = vmax.f32 %v620_v18, 0.0 }
  0x9a   :  { %v565_v28 = vpop.permute.xlu0 %564  ;;  %v762_v37 = vmul.f32 %v746_v24, %v631_v19  ;;  %v720_v39 = vand.u32 2147483647, %v704_v26  ;;  %v701_v40 = vsub.f32 %v1849_v4, %v670_v8  ;;  %v702_v43 = vsub.f32 %v1852_v5, %v670_v8 }
  0x9b   :  { %v1885_v41 = vpack.c.bf16 %v763_v20, %v761_v31  ;;  %v735_v42 = vsub.f32 1.0, %v719_v36  ;;  %v592_v44 = vsub.f32 %v1843_v56, %v570_v27  ;;  %1550 = vmatmul.mubr.msk.f32.vlgmr.msra.gmra.mrb[2].mxu0 %vm129_vm0, %v1549_v29  ;;  %1553 = vmatmul.mubr.msk.f32.vlgmr.msra.gmra.mrb[2].mxu1 %vm129_vm0, %v1552_v30  ;;  %v593_v48 = vsub.f32 %v1846_v57, %v570_v27 }
  0x9c   :  { %v1891_v45 = vpack.c.bf16 %v764_v23, %v762_v37  ;;  %v736_v46 = vsub.f32 1.0, %v720_v39  ;;  %v717_v47 = vand.u32 2147483647, %v701_v40  ;;  %849 = vmatprep.mubr.f32.mxu0 %v1725_v17  ;;  %944 = vmatprep.mubr.f32.mxu1 %v1725_v17  ;;  %v619_v50 = vsub.f32 1.0, %v603_v25 }
  0x9d   :  { %v685_v49 = vpop.permute.xlu1 %684  ;;  %v751_v51 = vmax.f32 %v735_v42, 0.0  ;;  %v718_v52 = vand.u32 2147483647, %v702_v43  ;;  %v590_v53 = vsub.f32 %v1843_v56, %v565_v28  ;;  %v608_v58 = vand.u32 2147483647, %v592_v44 }
  0x9e   :  { %v752_v54 = vmax.f32 %v736_v46, 0.0  ;;  %v733_v55 = vsub.f32 1.0, %v717_v47  ;;  %v591_v59 = vsub.f32 %v1846_v57, %v565_v28  ;;  %1593 = vmatprep.subr.bf16.mxu0 %v1891_v45  ;;  %1609 = vmatprep.subr.bf16.mxu1 %v1891_v45  ;;  %v680_v60 = vpop.permute.xlu0 %679  ;;  %v637_v61 = vmax.f32 %v621_v32, 0.0 }
  0x9f   :  { %v734_v62 = vsub.f32 1.0, %v718_v52  ;;  %v609_v63 = vand.u32 2147483647, %v593_v48  ;;  %1595 = vmatpush1.bf16.msra.mxu0 %v1885_v41  ;;  %1611 = vmatpush1.bf16.msra.mxu1 %v1885_v41  ;;  %v634_v0 = vmax.f32 %v618_v35, 0.0  ;;  %v767_v1 = vmul.f32 %v751_v51, %v636_v38 }
  0xa0   :  { %v749_v2 = vmax.f32 %v733_v55, 0.0  ;;  %v606_v3 = vand.u32 2147483647, %v590_v53  ;;  %v635_v6 = vmax.f32 %v619_v50, 0.0  ;;  %v768_v7 = vmul.f32 %v752_v54, %v637_v61 }
  0xa1   :  { %v750_v8 = vmax.f32 %v734_v62, 0.0  ;;  %v707_v9 = vsub.f32 %v1849_v4, %v685_v49  ;;  %v624_v11 = vsub.f32 1.0, %v608_v58  ;;  %v607_v12 = vand.u32 2147483647, %v591_v59  ;;  %v580_v14 = vpop.permute.xlu1 %579 }
  0xa2   :  { %v765_v10 = vmul.f32 %v749_v2, %v634_v0  ;;  %v708_v13 = vsub.f32 %v1852_v5, %v685_v49  ;;  %v625_v16 = vsub.f32 1.0, %v609_v63  ;;  %v705_v19 = vsub.f32 %v1849_v4, %v680_v60  ;;  %v575_v24 = vpop.permute.xlu0 %574 }
  0xa3   :  { %v766_v15 = vmul.f32 %v750_v8, %v635_v6  ;;  %v723_v18 = vand.u32 2147483647, %v707_v9  ;;  %v622_v21 = vsub.f32 1.0, %v606_v3  ;;  %v706_v23 = vsub.f32 %v1852_v5, %v680_v60 }
  0xa4   :  { %v1905_v20 = vpack.c.bf16 %v767_v1, %v765_v10  ;;  %v724_v22 = vand.u32 2147483647, %v708_v13  ;;  %v721_v27 = vand.u32 2147483647, %v705_v19  ;;  %v596_v28 = vsub.f32 %v1843_v56, %v580_v14 }
  0xa5   :  { %v1908_v25 = vpack.c.bf16 %v768_v7, %v766_v15  ;;  %v739_v26 = vsub.f32 1.0, %v723_v18  ;;  %v623_v29 = vsub.f32 1.0, %v607_v12  ;;  %v722_v31 = vand.u32 2147483647, %v706_v23  ;;  %v695_v44 = vpop.permute.xlu1 %694 }
  0xa6   :  { %v740_v30 = vsub.f32 1.0, %v724_v22  ;;  %v597_v32 = vsub.f32 %v1846_v57, %v580_v14  ;;  %v640_v35 = vmax.f32 %v624_v11, 0.0  ;;  %v737_v37 = vsub.f32 1.0, %v721_v27  ;;  %v690_v53 = vpop.permute.xlu0 %689 }
  0xa7   :  { %v755_v36 = vmax.f32 %v739_v26, 0.0  ;;  %v594_v38 = vsub.f32 %v1843_v56, %v575_v24  ;;  %1597 = vmatprep.subr.bf16.mxu0 %v1908_v25  ;;  %1613 = vmatprep.subr.bf16.mxu1 %v1908_v25  ;;  %v641_v39 = vmax.f32 %v625_v16, 0.0  ;;  %v738_v42 = vsub.f32 1.0, %v722_v31  ;;  %v1556_v31 = vld [vmem:[%s2069_s4 + $0x8] sm:$0xff] }
  0xa8   :  { %v756_v40 = vmax.f32 %v740_v30, 0.0  ;;  %v595_v43 = vsub.f32 %v1846_v57, %v575_v24  ;;  %1599 = vmatpush1.bf16.msra.mxu0 %v1905_v20  ;;  %1615 = vmatpush1.bf16.msra.mxu1 %v1905_v20  ;;  %v638_v46 = vmax.f32 %v622_v21, 0.0  ;;  %v753_v48 = vmax.f32 %v737_v37, 0.0  ;;  %v780_v30 = vld [vmem:[%s2069_s4] sm:$0xff]  ;;  %v1568_v37 = vld [vmem:[%s2069_s4 + $0x28] sm:$0xff] }
  0xa9   :  { %v771_v47 = vmul.f32 %v755_v36, %v640_v35  ;;  %v612_v49 = vand.u32 2147483647, %v596_v28  ;;  %v639_v50 = vmax.f32 %v623_v29, 0.0  ;;  %v754_v51 = vmax.f32 %v738_v42, 0.0  ;;  %v1562_v35 = vld [vmem:[%s2069_s4 + $0x18] sm:$0xff]  ;;  %v1565_v36 = vld [vmem:[%s2069_s4 + $0x20] sm:$0xff] }
  0xaa   :  { %v772_v56 = vmul.f32 %v756_v40, %v641_v39  ;;  %v613_v52 = vand.u32 2147483647, %v597_v32  ;;  %v769_v54 = vmul.f32 %v753_v48, %v638_v46  ;;  %v610_v55 = vand.u32 2147483647, %v594_v38  ;;  %v1559_v32 = vld [vmem:[%s2069_s4 + $0x10] sm:$0xff] }
  0xab   :  { %v711_v58 = vsub.f32 %v1849_v4, %v695_v44  ;;  %v770_v59 = vmul.f32 %v754_v51, %v639_v50  ;;  %v611_v57 = vand.u32 2147483647, %v595_v43  ;;  %v712_v60 = vsub.f32 %v1852_v5, %v695_v44 }
  0xac   :  { %v1920_v61 = vpack.c.bf16 %v771_v47, %v769_v54  ;;  %v628_v62 = vsub.f32 1.0, %v612_v49  ;;  %v709_v0 = vsub.f32 %v1849_v4, %v690_v53  ;;  %v629_v2 = vsub.f32 1.0, %v613_v52 }
  0xad   :  { %v727_v63 = vand.u32 2147483647, %v711_v58  ;;  %v1923_v1 = vpack.c.bf16 %v772_v56, %v770_v59  ;;  %v728_v3 = vand.u32 2147483647, %v712_v60  ;;  %v710_v6 = vsub.f32 %v1852_v5, %v690_v53 }
  0xae   :  { %v626_v7 = vsub.f32 1.0, %v610_v55  ;;  %v725_v9 = vand.u32 2147483647, %v709_v0  ;;  %v627_v10 = vsub.f32 1.0, %v611_v57  ;;  %v644_v13 = vmax.f32 %v628_v62, 0.0 }
  0xaf   :  { %v743_v8 = vsub.f32 1.0, %v727_v63  ;;  %v744_v11 = vsub.f32 1.0, %v728_v3  ;;  %v726_v12 = vand.u32 2147483647, %v710_v6  ;;  %1601 = vmatprep.subr.bf16.mxu0 %v1923_v1  ;;  %1617 = vmatprep.subr.bf16.mxu1 %v1923_v1  ;;  %v645_v4 = vmax.f32 %v629_v2, 0.0 }
  0xb0   :  { %v741_v15 = vsub.f32 1.0, %v725_v9  ;;  %1603 = vmatpush1.bf16.msra.mxu0 %v1920_v61  ;;  %1619 = vmatpush1.bf16.msra.mxu1 %v1920_v61  ;;  %v642_v18 = vmax.f32 %v626_v7, 0.0  ;;  %v643_v22 = vmax.f32 %v627_v10, 0.0 }
  0xb1   :  { %v759_v14 = vmax.f32 %v743_v8, 0.0  ;;  %v760_v16 = vmax.f32 %v744_v11, 0.0  ;;  %v742_v5 = vsub.f32 1.0, %v726_v12 }
  0xb2   :  { %v757_v21 = vmax.f32 %v741_v15, 0.0 }
  0xb3   :  { %v775_v19 = vmul.f32 %v759_v14, %v644_v13  ;;  %v776_v23 = vmul.f32 %v760_v16, %v645_v4  ;;  %v758_v24 = vmax.f32 %v742_v5, 0.0 }
  0xb4   :  { %v773_v26 = vmul.f32 %v757_v21, %v642_v18 }
  0xb5   :  { %v774_v27 = vmul.f32 %v758_v24, %v643_v22 }
  0xb6   :  { %v1930_v28 = vpack.c.bf16 %v775_v19, %v773_v26 }
  0xb7   :  { %v1932_v29 = vpack.c.bf16 %v776_v23, %v774_v27 }
  0xb9   :  { %1605 = vmatprep.subr.bf16.mxu0 %v1932_v29  ;;  %1621 = vmatprep.subr.bf16.mxu1 %v1932_v29 }
  0xba   :  { %1607 = vmatpush1.bf16.msra.mxu0 %v1930_v28  ;;  %1623 = vmatpush1.bf16.msra.mxu1 %v1930_v28 }
  0xbb   :  { %1625 = vmatprep.subr.bf16.mxu0 %v1891_v45  ;;  %1641 = vmatprep.subr.bf16.mxu1 %v1891_v45 }
  0xbd   :  { %1554 = vmatmul.mubr.msk.f32.vlgmr.msra.gmra.mrb[4].mxu0 %vm781_vm1, %v780_v30  ;;  %1557 = vmatmul.mubr.msk.f32.vlgmr.msra.gmra.mrb[4].mxu1 %vm781_vm1, %v1556_v31 }
  0xbe   :  { %1627 = vmatpush1.bf16.msra.mxu0 %v1885_v41  ;;  %1643 = vmatpush1.bf16.msra.mxu1 %v1885_v41 }
  0xbf   :  { %1629 = vmatprep.subr.bf16.mxu0 %v1908_v25  ;;  %1645 = vmatprep.subr.bf16.mxu1 %v1908_v25 }
  0xc0   :  { %1039 = vmatprep.mubr.f32.mxu0 %v1725_v17  ;;  %1134 = vmatprep.mubr.f32.mxu1 %v1725_v17 }
  0xc2   :  { %1631 = vmatpush1.bf16.msra.mxu0 %v1905_v20  ;;  %1647 = vmatpush1.bf16.msra.mxu1 %v1905_v20 }
  0xc3   :  { %1633 = vmatprep.subr.bf16.mxu0 %v1923_v1  ;;  %1649 = vmatprep.subr.bf16.mxu1 %v1923_v1 }
  0xc6   :  { %1635 = vmatpush1.bf16.msra.mxu0 %v1920_v61  ;;  %1651 = vmatpush1.bf16.msra.mxu1 %v1920_v61 }
  0xc7   :  { %1637 = vmatprep.subr.bf16.mxu0 %v1932_v29  ;;  %1653 = vmatprep.subr.bf16.mxu1 %v1932_v29 }
  0xca   :  { %1639 = vmatpush1.bf16.msra.mxu0 %v1930_v28  ;;  %1655 = vmatpush1.bf16.msra.mxu1 %v1930_v28 }
  0xcb   :  { %1657 = vmatprep.subr.bf16.mxu0 %v1891_v45  ;;  %1673 = vmatprep.subr.bf16.mxu1 %v1891_v45 }
  0xcd   :  { %1560 = vmatmul.mubr.msk.f32.vlgmr.msra.gmra.mrb[6].mxu0 %vm781_vm1, %v1559_v32  ;;  %1563 = vmatmul.mubr.msk.f32.vlgmr.msra.gmra.mrb[6].mxu1 %vm781_vm1, %v1562_v35 }
  0xce   :  { %1659 = vmatpush1.bf16.msra.mxu0 %v1885_v41  ;;  %1675 = vmatpush1.bf16.msra.mxu1 %v1885_v41 }
  0xcf   :  { %1661 = vmatprep.subr.bf16.mxu0 %v1908_v25  ;;  %1677 = vmatprep.subr.bf16.mxu1 %v1908_v25 }
  0xd0   :  { %1229 = vmatprep.mubr.f32.mxu0 %v1725_v17  ;;  %1324 = vmatprep.mubr.f32.mxu1 %v1725_v17 }
  0xd2   :  { %1663 = vmatpush1.bf16.msra.mxu0 %v1905_v20  ;;  %1679 = vmatpush1.bf16.msra.mxu1 %v1905_v20 }
  0xd3   :  { %1665 = vmatprep.subr.bf16.mxu0 %v1923_v1  ;;  %1681 = vmatprep.subr.bf16.mxu1 %v1923_v1 }
  0xd6   :  { %1667 = vmatpush1.bf16.msra.mxu0 %v1920_v61  ;;  %1683 = vmatpush1.bf16.msra.mxu1 %v1920_v61 }
  0xd7   :  { %1669 = vmatprep.subr.bf16.mxu0 %v1932_v29  ;;  %1685 = vmatprep.subr.bf16.mxu1 %v1932_v29 }
  0xda   :  { %1671 = vmatpush1.bf16.msra.mxu0 %v1930_v28  ;;  %1687 = vmatpush1.bf16.msra.mxu1 %v1930_v28 }
  0xdb   :  { %1689 = vmatprep.subr.bf16.mxu0 %v1891_v45  ;;  %1705 = vmatprep.subr.bf16.mxu1 %v1891_v45  ;;  %v26_v45 = vld [vmem:[%s2067_s0] ss:$4 sm:$0x3] }
  0xdd   :  { %1566 = vmatmul.mubr.msk.f32.vlgmr.msra.gmra.mrb[8].mxu0 %vm781_vm1, %v1565_v36  ;;  %1569 = vmatmul.mubr.msk.f32.vlgmr.msra.gmra.mrb[8].mxu1 %vm781_vm1, %v1568_v37 }
  0xde   :  { %1691 = vmatpush1.bf16.msra.mxu0 %v1885_v41  ;;  %1707 = vmatpush1.bf16.msra.mxu1 %v1885_v41  ;;  %v1574_v41 = vld [vmem:[%s2069_s4 + $0x38] sm:$0xff] }
  0xdf   :  { %1693 = vmatprep.subr.bf16.mxu0 %v1908_v25  ;;  %1709 = vmatprep.subr.bf16.mxu1 %v1908_v25 }
  0xe0   :  { %1419 = vmatprep.mubr.f32.mxu0 %v1725_v17  ;;  %1514 = vmatprep.mubr.f32.mxu1 %v1725_v17  ;;  %v1571_v17 = vld [vmem:[%s2069_s4 + $0x30] sm:$0xff] }
  0xe2   :  { %1695 = vmatpush1.bf16.msra.mxu0 %v1905_v20  ;;  %1711 = vmatpush1.bf16.msra.mxu1 %v1905_v20  ;;  %v35_v20 = vadd.f32 1.0, %v26_v45 }
  0xe3   :  { %1697 = vmatprep.subr.bf16.mxu0 %v1923_v1  ;;  %1713 = vmatprep.subr.bf16.mxu1 %v1923_v1 }
  0xe4   :  { %v36_v25 = vmul.f32 1.5, %v35_v20  ;;  %v522_v22 = vmul.f32 3.5, %v35_v20 }
  0xe6   :  { %1699 = vmatpush1.bf16.msra.mxu0 %v1920_v61  ;;  %1715 = vmatpush1.bf16.msra.mxu1 %v1920_v61  ;;  %v37_v38 = vmax.f32 %v36_v25, 0.0  ;;  %v523_v27 = vmax.f32 %v522_v22, 0.0 }
  0xe7   :  { %1701 = vmatprep.subr.bf16.mxu0 %v1932_v29  ;;  %1717 = vmatprep.subr.bf16.mxu1 %v1932_v29 }
  0xe8   :  { %v38_v39 = vmin.f32 %v37_v38, 3.0 }
  0xea   :  { %1703 = vmatpush1.bf16.msra.mxu0 %v1930_v28  ;;  %1719 = vmatpush1.bf16.msra.mxu1 %v1930_v28  ;;  %v1545_v40 = vadd.f32 -1.0, %v38_v39  ;;  %v125_v42 = vand.u32 2147483647, %v38_v39  ;;  %v1548_v44 = vadd.f32 -2.0, %v38_v39  ;;  %v1551_v46 = vadd.f32 -3.0, %v38_v39 }
  0xeb   :  { %v524_v28 = vmin.f32 %v523_v27, 7.0 }
  0xec   :  { %v220_v43 = vand.u32 2147483647, %v1545_v40  ;;  %v126_v47 = vsub.f32 1.0, %v125_v42  ;;  %v315_v49 = vand.u32 2147483647, %v1548_v44 }
  0xed   :  { %1572 = vmatmul.mubr.msk.f32.vlgmr.msra.gmra.mrb[10].mxu0 %vm781_vm1, %v1571_v17  ;;  %1575 = vmatmul.mubr.msk.f32.vlgmr.msra.gmra.mrb[10].mxu1 %vm781_vm1, %v1574_v41  ;;  %v410_v50 = vand.u32 2147483647, %v1551_v46  ;;  %v1555_v29 = vadd.f32 -1.0, %v524_v28  ;;  %v777_v30 = vand.u32 2147483647, %v524_v28  ;;  %v1558_v45 = vadd.f32 -2.0, %v524_v28 }
  0xee   :  { %v221_v48 = vsub.f32 1.0, %v220_v43  ;;  %v127_v56 = vmax.f32 %v126_v47, 0.0  ;;  %v316_v52 = vsub.f32 1.0, %v315_v49  ;;  %v1561_v20 = vadd.f32 -3.0, %v524_v28 }
  0xef   :  { %v411_v53 = vsub.f32 1.0, %v410_v50  ;;  %v872_v31 = vand.u32 2147483647, %v1555_v29  ;;  %v778_v32 = vsub.f32 1.0, %v777_v30  ;;  %v967_v47 = vand.u32 2147483647, %v1558_v45 }
  0xf0   :  { %v222_v51 = vmax.f32 %v221_v48, 0.0  ;;  %v208_v54 = vrot.slane %v127_v56, %v1834_v33  ;;  %v317_v58 = vmax.f32 %v316_v52, 0.0  ;;  %v212_v57 = vrot.slane %v127_v56, %v1836_v34 }
  0xf1   :  { %v412_v59 = vmax.f32 %v411_v53, 0.0  ;;  %v873_v35 = vsub.f32 1.0, %v872_v31  ;;  %v779_v36 = vmax.f32 %v778_v32, 0.0  ;;  %v1062_v48 = vand.u32 2147483647, %v1561_v20 }
  0xf2   :  { %v303_v55 = vrot.slane %v222_v51, %v1834_v33  ;;  %v307_v60 = vrot.slane %v222_v51, %v1836_v34  ;;  %v398_v3 = vrot.slane %v317_v58, %v1834_v33  ;;  %v402_v9 = vrot.slane %v317_v58, %v1836_v34 }
  0xf3   :  { %v493_v6 = vrot.slane %v412_v59, %v1834_v33  ;;  %v497_v10 = vrot.slane %v412_v59, %v1836_v34  ;;  %v874_v37 = vmax.f32 %v873_v35, 0.0  ;;  %v860_v17 = vrot.slane %v779_v36, %v1834_v33 }
  0xf4   :  { %v864_v25 = vrot.slane %v779_v36, %v1836_v34  ;;  %v968_v52 = vsub.f32 1.0, %v967_v47  ;;  %v1063_v53 = vsub.f32 1.0, %v1062_v48  ;;  %v1573_v22 = vadd.f32 -7.0, %v524_v28 }
  0xf5   :  { %v955_v41 = vrot.slane %v874_v37, %v1834_v33  ;;  %v959_v38 = vrot.slane %v874_v37, %v1836_v34 }
  0xf6   :  { %v1442_v36 = vand.u32 2147483647, %v1573_v22 }
 0x16a   :  { %v199_v61 = vpop.f32.mrb[0].mxu0  ;;  %v294_v62 = vpop.f32.mrb[0].mxu1 }
 0x16b   :  { %v215_v63 = vmul.f32 %v208_v54, %v199_v61  ;;  %v310_v0 = vmul.f32 %v303_v55, %v294_v62  ;;  %v201_v1 = vpop.f32.mrb[1].mxu0  ;;  %v296_v2 = vpop.f32.mrb[1].mxu1  ;;  %v969_v54 = vmax.f32 %v968_v52, 0.0  ;;  %v1064_v55 = vmax.f32 %v1063_v53, 0.0 }
 0x16c   :  { %v216_v7 = vmul.f32 %v212_v57, %v201_v1  ;;  %v311_v8 = vmul.f32 %v307_v60, %v296_v2  ;;  %v1564_v57 = vadd.f32 -4.0, %v524_v28  ;;  %v1567_v60 = vadd.f32 -5.0, %v524_v28 }
 0x16d   :  { %v312_v11 = vadd.f32 %v310_v0, %v215_v63  ;;  %v1050_v58 = vrot.slane %v969_v54, %v1834_v33  ;;  %v1145_v59 = vrot.slane %v1064_v55, %v1834_v33  ;;  %v1054_v61 = vrot.slane %v969_v54, %v1836_v34 }
 0x16e   :  { %v313_v12 = vadd.f32 %v311_v8, %v216_v7  ;;  %v389_v13 = vpop.f32.mrb[2].mxu0  ;;  %v484_v14 = vpop.f32.mrb[2].mxu1  ;;  %v1149_v62 = vrot.slane %v1064_v55, %v1836_v34  ;;  %v1157_v7 = vand.u32 2147483647, %v1564_v57  ;;  %v1252_v8 = vand.u32 2147483647, %v1567_v60 }
 0x16f   :  { %v405_v15 = vmul.f32 %v398_v3, %v389_v13  ;;  %v391_v4 = vpop.f32.mrb[3].mxu0  ;;  %v500_v16 = vmul.f32 %v493_v6, %v484_v14  ;;  %v486_v5 = vpop.f32.mrb[3].mxu1 }
 0x170   :  { %v406_v18 = vmul.f32 %v402_v9, %v391_v4  ;;  %v501_v19 = vmul.f32 %v497_v10, %v486_v5  ;;  %v1158_v14 = vsub.f32 1.0, %v1157_v7 }
 0x171   :  { %v407_v21 = vadd.f32 %v405_v15, %v312_v11  ;;  %v1253_v15 = vsub.f32 1.0, %v1252_v8 }
 0x172   :  { %v408_v23 = vadd.f32 %v406_v18, %v313_v12 }
 0x173   :  { %v502_v24 = vadd.f32 %v500_v16, %v407_v21  ;;  %v1159_v16 = vmax.f32 %v1158_v14, 0.0  ;;  %v1254_v5 = vmax.f32 %v1253_v15, 0.0  ;;  %v1570_v21 = vadd.f32 -6.0, %v524_v28 }
 0x174   :  { %v503_v26 = vadd.f32 %v501_v19, %v408_v23 }
 0x175   :  { %504 = vst [vmem:[%s2070_s7] sm:$0xff] %v502_v24  ;;  %v1240_v18 = vrot.slane %v1159_v16, %v1834_v33  ;;  %v1335_v19 = vrot.slane %v1254_v5, %v1834_v33  ;;  %v1244_v23 = vrot.slane %v1159_v16, %v1836_v34  ;;  %v1339_v24 = vrot.slane %v1254_v5, %v1836_v34 }
 0x176   :  { %505 = vst [vmem:[%s2070_s7 + $0x8] sm:$0xff] %v503_v26  ;;  %v1347_v35 = vand.u32 2147483647, %v1570_v21 }
 0x190   :  { %v851_v39 = vpop.f32.mrb[4].mxu0  ;;  %v946_v40 = vpop.f32.mrb[4].mxu1 }
 0x191   :  { %v867_v42 = vmul.f32 %v860_v17, %v851_v39  ;;  %v962_v43 = vmul.f32 %v955_v41, %v946_v40  ;;  %v853_v44 = vpop.f32.mrb[5].mxu0  ;;  %v948_v46 = vpop.f32.mrb[5].mxu1 }
 0x192   :  { %v868_v49 = vmul.f32 %v864_v25, %v853_v44  ;;  %v963_v50 = vmul.f32 %v959_v38, %v948_v46  ;;  %v1348_v25 = vsub.f32 1.0, %v1347_v35  ;;  %v1443_v38 = vsub.f32 1.0, %v1442_v36 }
 0x193   :  { %v964_v56 = vadd.f32 %v962_v43, %v867_v42 }
 0x194   :  { %v965_v51 = vadd.f32 %v963_v50, %v868_v49  ;;  %v1349_v39 = vmax.f32 %v1348_v25, 0.0  ;;  %v1444_v40 = vmax.f32 %v1443_v38, 0.0 }
 0x196   :  { %v1430_v42 = vrot.slane %v1349_v39, %v1834_v33  ;;  %v1525_v43 = vrot.slane %v1444_v40, %v1834_v33  ;;  %v1434_v44 = vrot.slane %v1349_v39, %v1836_v34  ;;  %v1529_v46 = vrot.slane %v1444_v40, %v1836_v34 }
 0x1a0   :  { %v1041_v63 = vpop.f32.mrb[6].mxu0  ;;  %v1136_v0 = vpop.f32.mrb[6].mxu1 }
 0x1a1   :  { %v1057_v1 = vmul.f32 %v1050_v58, %v1041_v63  ;;  %v1043_v2 = vpop.f32.mrb[7].mxu0  ;;  %v1152_v3 = vmul.f32 %v1145_v59, %v1136_v0  ;;  %v1138_v6 = vpop.f32.mrb[7].mxu1 }
 0x1a2   :  { %v1058_v9 = vmul.f32 %v1054_v61, %v1043_v2  ;;  %v1153_v10 = vmul.f32 %v1149_v62, %v1138_v6 }
 0x1a3   :  { %v1059_v11 = vadd.f32 %v1057_v1, %v964_v56 }
 0x1a4   :  { %v1060_v12 = vadd.f32 %v1058_v9, %v965_v51 }
 0x1a5   :  { %v1154_v13 = vadd.f32 %v1152_v3, %v1059_v11 }
 0x1a6   :  { %v1155_v4 = vadd.f32 %v1153_v10, %v1060_v12 }
 0x1b0   :  { %v1231_v26 = vpop.f32.mrb[8].mxu0  ;;  %v1326_v27 = vpop.f32.mrb[8].mxu1 }
 0x1b1   :  { %v1247_v29 = vmul.f32 %v1240_v18, %v1231_v26  ;;  %v1233_v30 = vpop.f32.mrb[9].mxu0  ;;  %v1342_v31 = vmul.f32 %v1335_v19, %v1326_v27  ;;  %v1328_v32 = vpop.f32.mrb[9].mxu1 }
 0x1b2   :  { %v1248_v37 = vmul.f32 %v1244_v23, %v1233_v30  ;;  %v1343_v17 = vmul.f32 %v1339_v24, %v1328_v32 }
 0x1b3   :  { %v1249_v41 = vadd.f32 %v1247_v29, %v1154_v13 }
 0x1b4   :  { %v1250_v45 = vadd.f32 %v1248_v37, %v1155_v4 }
 0x1b5   :  { %v1344_v20 = vadd.f32 %v1342_v31, %v1249_v41 }
 0x1b6   :  { %v1345_v28 = vadd.f32 %v1343_v17, %v1250_v45 }
 0x1c0   :  { %v1421_v47 = vpop.f32.mrb[10].mxu0  ;;  %v1516_v48 = vpop.f32.mrb[10].mxu1 }
 0x1c1   :  { %v1437_v49 = vmul.f32 %v1430_v42, %v1421_v47  ;;  %v1423_v50 = vpop.f32.mrb[11].mxu0  ;;  %v1532_v56 = vmul.f32 %v1525_v43, %v1516_v48  ;;  %v1518_v51 = vpop.f32.mrb[11].mxu1 }
 0x1c2   :  { %v1438_v52 = vmul.f32 %v1434_v44, %v1423_v50  ;;  %v1533_v53 = vmul.f32 %v1529_v46, %v1518_v51 }
 0x1c3   :  { %v1439_v54 = vadd.f32 %v1437_v49, %v1344_v20 }
 0x1c4   :  { %v1440_v55 = vadd.f32 %v1438_v52, %v1345_v28 }
 0x1c5   :  { %v1534_v58 = vadd.f32 %v1532_v56, %v1439_v54 }
 0x1c6   :  { %v1535_v59 = vadd.f32 %v1533_v53, %v1440_v55 }
 0x1c7   :  { %1536 = vst [vmem:[%s2070_s7 + $0x10] sm:$0xff] %v1534_v58 }
 0x1c8   :  { %1537 = vst [vmem:[%s2070_s7 + $0x18] sm:$0xff] %v1535_v59 }

</bundles_post_ra>
